<compile_context>
chip_gen: v7x
topology: tpu7x:2x2x1
jax: 0.10.0
libtpu: 0.0.40
codegen_flags: <defaults>
</compile_context>

<pallas_src>
import jax
import jax.numpy as jnp
from jax.experimental import pallas as pl
from jax.experimental.pallas import tpu as pltpu

ALPHA = 1.0
GAMMA = 2.0
_MIB = 1024 * 1024


def _round_up(v, m):
    return ((v + m - 1) // m) * m


def _sublane_align(dtype):
    # 8 rows for 4-byte dtypes, 16 for bf16/f16, 32 for int8/fp8.
    itemsize = jnp.dtype(dtype).itemsize
    return max(8, 32 // max(itemsize, 1))


def _choose_tile_n(n, c, dtype):
    """Row tile sized by block BYTES (~4 MiB of input), sublane-aligned."""
    align = _sublane_align(dtype)
    itemsize = jnp.dtype(dtype).itemsize
    target_block_bytes = 4 * _MIB            # good middle ground v5e/v6e/v7x
    t = max(align, target_block_bytes // max(c * itemsize, 1))
    t = min(t, _round_up(n, align))          # never larger than the batch
    t = _round_up(t, align)
    # v7x has 2 TensorCores: if everything fits one block but the batch is big
    # enough to amortize the ~0.35us per-step cost twice, split into 2 tiles.
    if t >= n and n * c * itemsize >= 2 * _MIB:
        t = _round_up(pl.cdiv(n, 2), align)
    return t


def _make_ce_partial_kernel(n_valid, tile_n, num_classes):
    """Per-tile sum of per-row cross-entropy; garbage edge rows masked out."""

    def kernel(x_ref, t_ref, out_ref):
        x = x_ref[...].astype(jnp.float32)             # (TILE_N, C)
        t = t_ref[...]                                 # (TILE_N, 1) int32

        # Target logit via compare+select against a (1, C) column iota
        # broadcast over the target column (no full int32 (TILE_N, C) temp).
        col = jax.lax.broadcasted_iota(jnp.int32, (1, num_classes), 1)
        x_at_t = jnp.sum(jnp.where(col == t, x, 0.0), axis=1, keepdims=True)

        # Per-row cross entropy with max-subtracted log-sum-exp.
        m = jnp.max(x, axis=1, keepdims=True)
        lse = m + jnp.log(jnp.sum(jnp.exp(x - m), axis=1, keepdims=True))
        ce = lse - x_at_t                              # (TILE_N, 1)

        # Mask rows beyond the true batch size (the last, partial edge block
        # reads unspecified data).  Select BEFORE the sum — never multiply —
        # so NaN/Inf from garbage rows cannot propagate.
        row = (pl.program_id(0) * tile_n
               + jax.lax.broadcasted_iota(jnp.int32, ce.shape, 0))
        ce = jnp.where(row < n_valid, ce, 0.0)

        # Lane-dense, unmasked (1, 8, 128) store; wrapper reads [i, 0, 0].
        out_ref[...] = jnp.broadcast_to(jnp.sum(ce), out_ref.shape)

    return kernel


def focal_loss(logits, targets, *, alpha=ALPHA, gamma=GAMMA, reduce=True,
               tile_n=None):
    """logits: (N, C) float (f32 or bf16), targets: (N,) int -> scalar f32."""
    n, c = logits.shape
    align = _sublane_align(logits.dtype)
    itemsize = jnp.dtype(logits.dtype).itemsize
    if tile_n is None:
        tile_n = _choose_tile_n(n, c, logits.dtype)
    else:
        tile_n = _round_up(max(int(tile_n), align), align)
    num_tiles = pl.cdiv(n, tile_n)

    # No wrapper-side padding of logits: avoids an extra full HBM read+write.
    t = targets.astype(jnp.int32).reshape(n, 1)

    # VMEM budget: 2x double-buffered input block + ~4 f32 (TILE_N, C)
    # temporaries + targets + output, with 2x margin, capped at 48 MiB
    # (safe on v7x's 64 MiB physical VMEM; plenty of headroom on v5e/v6e).
    block_in_bytes = tile_n * c * itemsize
    vmem_needed = (2 * block_in_bytes + 4 * tile_n * c * 4
                   + 2 * tile_n * 4 + 64 * 1024)
    vmem_limit = int(min(max(2 * vmem_needed, 16 * _MIB), 48 * _MIB))

    cost = pl.CostEstimate(
        flops=8 * n * c,
        transcendentals=n * c,
        bytes_accessed=n * c * itemsize + n * 4 + num_tiles * 8 * 128 * 4,
    )

    partials = pl.pallas_call(
        _make_ce_partial_kernel(n, tile_n, c),
        out_shape=jax.ShapeDtypeStruct((num_tiles, 8, 128), jnp.float32),
        grid=(num_tiles,),
        in_specs=[
            pl.BlockSpec((tile_n, c), lambda i: (i, 0)),
            pl.BlockSpec((tile_n, 1), lambda i: (i, 0)),
        ],
        out_specs=pl.BlockSpec((1, 8, 128), lambda i: (i, 0, 0)),
        compiler_params=pltpu.CompilerParams(
            dimension_semantics=("parallel",),
            vmem_limit_bytes=vmem_limit),
        cost_estimate=cost,
    )(logits, t)

    # Scalar epilogue (matches PyTorch: focal transform on the MEAN CE).
    ce_mean = jnp.sum(partials[:, 0, 0]) / jnp.float32(n)
    pt = jnp.exp(-ce_mean)
    one_minus_pt = 1.0 - pt
    if gamma == 2:
        modulator = one_minus_pt * one_minus_pt   # explicit square, no float pow
    else:
        modulator = one_minus_pt ** gamma
    f_loss = alpha * modulator * ce_mean
    # reduce=True applies mean() to an already-scalar loss -> identity.
    # TODO(synk): reduce=False also returns this scalar (CE is already mean-reduced).
    return f_loss


def _reference(logits, targets, alpha=ALPHA, gamma=GAMMA):
    x = logits.astype(jnp.float32)
    logp = jax.nn.log_softmax(x, axis=1)
    ce = -jnp.take_along_axis(logp, targets.astype(jnp.int32)[:, None], axis=1)[:, 0]
    ce_mean = jnp.mean(ce)
    pt = jnp.exp(-ce_mean)
    return alpha * (1.0 - pt) ** gamma * ce_mean


if __name__ == "__main__":
    key = jax.random.PRNGKey(0)
    k1, k2 = jax.random.split(key)
    N, C = 10, 32
    logits = jax.random.normal(k1, (N, C), dtype=jnp.float32) * 3.0
    targets = jax.random.randint(k2, (N,), 0, C, dtype=jnp.int32)

    ref = _reference(logits, targets)

    # Default path: single tile, partial edge block masked in-kernel (no pad).
    loss = focal_loss(logits, targets)
    jax.block_until_ready(loss)
    assert jnp.allclose(loss, ref, atol=1e-5, rtol=1e-5), (loss, ref)

    # Multi-tile path: forces a grid of 2 "parallel" row tiles with a partial
    # second tile (N=10, TILE_N=8) exercising the edge-block masking.
    loss2 = focal_loss(logits, targets, tile_n=8)
    jax.block_until_ready(loss2)
    assert jnp.allclose(loss2, ref, atol=1e-5, rtol=1e-5), (loss2, ref)

    # bf16 logits: 16-row sublane alignment path, cast to f32 in-kernel.
    logits_bf16 = logits.astype(jnp.bfloat16)
    ref_bf16 = _reference(logits_bf16, targets)
    loss3 = focal_loss(logits_bf16, targets)
    jax.block_until_ready(loss3)
    assert jnp.allclose(loss3, ref_bf16, atol=1e-4, rtol=1e-4), (loss3, ref_bf16)

    print("KERNEL_OK")
</pallas_src>

<mosaic_0001>
module attributes {stable_mosaic.version = 11 : i64} {
  func.func @kernel(%arg0: i32, %arg1: memref<16x32xf32, #tpu.memory_space<vmem>>, %arg2: memref<16x1xi32, #tpu.memory_space<vmem>>, %arg3: memref<1x8x128xf32, #tpu.memory_space<vmem>>) attributes {dimension_semantics = [#tpu.dimension_semantics<parallel>], iteration_bounds = array<i64: 1>, scalar_prefetch = 0 : i64, scratch_operands = 0 : i64, tpu.core_type = #tpu.core_type<tc>, window_params = [{transform_indices = @transform_0, window_bounds = array<i64: 16, 32>}, {transform_indices = @transform_1, window_bounds = array<i64: 16, 1>}, {transform_indices = @transform_2, window_bounds = array<i64: 1, 8, 128>}]} {
    %c0 = arith.constant 0 : index
    %c0_0 = arith.constant 0 : index
    %0 = vector.load %arg1[%c0, %c0_0] : memref<16x32xf32, #tpu.memory_space<vmem>>, vector<16x32xf32>
    %c0_1 = arith.constant 0 : index
    %c0_2 = arith.constant 0 : index
    %1 = vector.load %arg2[%c0_1, %c0_2] : memref<16x1xi32, #tpu.memory_space<vmem>>, vector<16x1xi32>
    %2 = tpu.iota {dimensions = array<i32: 1>} : vector<1x32xi32>
    %3 = vector.broadcast %2 : vector<1x32xi32> to vector<16x32xi32>
    %4 = vector.broadcast %1 : vector<16x1xi32> to vector<16x32xi32>
    %5 = arith.cmpi eq, %3, %4 : vector<16x32xi32>
    %cst = arith.constant 0.000000e+00 : f32
    %6 = vector.broadcast %cst : f32 to vector<16x32xf32>
    %7 = arith.select %5, %0, %6 : vector<16x32xi1>, vector<16x32xf32>
    %cst_3 = arith.constant dense<0.000000e+00> : vector<16xf32>
    %8 = vector.multi_reduction <add>, %7, %cst_3 [1] : vector<16x32xf32> to vector<16xf32>
    %9 = vector.shape_cast %8 : vector<16xf32> to vector<16x1xf32>
    %cst_4 = arith.constant dense<0xFF800000> : vector<16xf32>
    %10 = vector.multi_reduction <maximumf>, %0, %cst_4 [1] : vector<16x32xf32> to vector<16xf32>
    %11 = vector.shape_cast %10 : vector<16xf32> to vector<16x1xf32>
    %12 = vector.broadcast %11 : vector<16x1xf32> to vector<16x32xf32>
    %13 = arith.subf %0, %12 : vector<16x32xf32>
    %14 = math.exp %13 : vector<16x32xf32>
    %cst_5 = arith.constant dense<0.000000e+00> : vector<16xf32>
    %15 = vector.multi_reduction <add>, %14, %cst_5 [1] : vector<16x32xf32> to vector<16xf32>
    %16 = vector.shape_cast %15 : vector<16xf32> to vector<16x1xf32>
    %17 = math.log %16 : vector<16x1xf32>
    %18 = arith.addf %11, %17 : vector<16x1xf32>
    %19 = arith.subf %18, %9 : vector<16x1xf32>
    %c16_i32 = arith.constant 16 : i32
    %20 = arith.muli %arg0, %c16_i32 : i32
    %21 = tpu.iota {dimensions = array<i32: 0>} : vector<16x1xi32>
    %22 = vector.broadcast %20 : i32 to vector<16x1xi32>
    %23 = arith.addi %22, %21 : vector<16x1xi32>
    %c10_i32 = arith.constant 10 : i32
    %24 = vector.broadcast %c10_i32 : i32 to vector<16x1xi32>
    %25 = arith.cmpi slt, %23, %24 : vector<16x1xi32>
    %cst_6 = arith.constant 0.000000e+00 : f32
    %26 = vector.broadcast %cst_6 : f32 to vector<16x1xf32>
    %27 = arith.select %25, %19, %26 : vector<16x1xi1>, vector<16x1xf32>
    %28 = vector.shape_cast %27 : vector<16x1xf32> to vector<1x16x1xf32>
    %cst_7 = arith.constant dense<0.000000e+00> : vector<1xf32>
    %29 = vector.multi_reduction <add>, %28, %cst_7 [1, 2] : vector<1x16x1xf32> to vector<1xf32>
    %30 = vector.shape_cast %29 : vector<1xf32> to vector<1x1x1xf32>
    %31 = vector.extract %30[0, 0, 0] : f32 from vector<1x1x1xf32>
    %32 = vector.broadcast %31 : f32 to vector<1x8x128xf32>
    %c0_8 = arith.constant 0 : index
    %c0_9 = arith.constant 0 : index
    %c0_10 = arith.constant 0 : index
    %33 = vector.load %arg3[%c0_8, %c0_9, %c0_10] : memref<1x8x128xf32, #tpu.memory_space<vmem>>, vector<1x8x128xf32>
    tpu.vector_store %arg3[%c0_8, %c0_9, %c0_10], %32 {strides = array<i32>} : memref<1x8x128xf32, #tpu.memory_space<vmem>>, vector<1x8x128xf32>,
    return
  }
  func.func @transform_0(%arg0: i32) -> (i32, i32) {
    %c0_i32 = arith.constant 0 : i32
    %c0_i32_0 = arith.constant 0 : i32
    return %arg0, %c0_i32 : i32, i32
  }
  func.func @transform_1(%arg0: i32) -> (i32, i32) {
    %c0_i32 = arith.constant 0 : i32
    %c0_i32_0 = arith.constant 0 : i32
    return %arg0, %c0_i32 : i32, i32
  }
  func.func @transform_2(%arg0: i32) -> (i32, i32, i32) {
    %c0_i32 = arith.constant 0 : i32
    %c0_i32_0 = arith.constant 0 : i32
    %c0_i32_1 = arith.constant 0 : i32
    return %arg0, %c0_i32, %c0_i32_0 : i32, i32, i32
  }
}

</mosaic_0001>

<bundles_post_ra>
// kernel: tpu_custom_call.1
= control target key start
LH: loop header
LB: loop body
LE: loop exit
PB: predicated region body
PF: predicated region fallthrough
CT: control target
= control target key end

     0   :  { %vm28_vm0 = vcmask 261120   ;;  %v139_v4 = vmov 0   ;;  %s186_s0 = inlined_call_operand.vmem [shape: f32[10,32], index: 0, kind: input, shape index: {}]   ;;  %s187_s1 = inlined_call_operand.vmem [shape: s32[10,1], index: 1, kind: input, shape index: {}]   ;;  %s188_s2 = inlined_call_operand.hbm [shape: f32[1,8,128], index: 2, kind: output, shape index: {}]  }
   0x1   :  { %v13_v0 = vld [vmem:[%s186_s0 + $0x8] sm:$0xff]  ;;  %v12_v1 = vld [vmem:[%s186_s0] sm:$0xff]  ;;  %105 = vset.pattern.permute.xlu1 %v139_v4  ;;  %106 = vset.pattern.permute.xlu0 %v139_v4 }
   0x2   :  { %v15_v2 = vld [vmem:[%s187_s1 + $0x8] sm:$0xff]  ;;  %v38_v3 = vsel %vm28_vm0, %v13_v0, -inf }
   0x3   :  { %7 = vsyncpa [#allocation3], 0  ;;  %39 = vmax.xlane.f32.xlu0 %v38_v3  ;;  %22 = vperm.xlu1 %105, %v15_v2   ;;  %v35_v5 = vsel %vm28_vm0, %v12_v1, -inf  ;;  %v14_v6 = vld [vmem:[%s187_s1] sm:$0xff]  ;;  %v16_v11 = vlaneseq  ;;  %vm72_vm4 = vcmask 7168   ;;  %s140_s0 = smov [#allocation2]  }
   0x4   :  { %s93_s1 = sshll.u32 %s140_s0, 4  ;;  %s94_s1 = int_to_ptr.vmem [resolvable:$true] %s93_s1 }
   0x5   :  { %v17_v15 = vand.u32 127, %v16_v11  ;;  %v63_v27 = vshrl.u32 %v16_v11, 7  ;;  %s115_s18 = scalar_lea.vmem %s94_s1, 128  ;;  %p120_p1 = scmp.lt.s32.totalorder %s94_s1, %s94_s1 }
   0x6   :  { %p116_p0 = scmp.ne.s32.totalorder %s94_s1, %s115_s18  ;;  %p121_p2 = scmp.lt.s32.totalorder %s115_s18, %s115_s18 }
   0x7   :  { %36 = vmax.xlane.f32.xlu0 %v35_v5  ;;  %19 = vperm.xlu1 %105, %v14_v6   ;;  %v64_v30 = vadd.s32 8, %v63_v27 }
   0x8   :  { %p122_p3 = por %p121_p2, %p120_p1 }
   0x9   :  { %vm69_vm3 = vcmp.lt.s32.totalorder %v64_v30, 10 }
   0xa   :  { %p123_p4 = pnand %p122_p3, %p116_p0 }
  0x82   :  { %v23_v14 = vpop.permute.xlu1 %22 }
  0x83   :  { %vm25_vm1 = vcmp.eq.s32.totalorder %v17_v15, %v23_v14 }
  0x84   :  { %v27_v18 = vsel %vm25_vm1, %v13_v0, 0.0 }
  0x85   :  { %v32_v20 = vsel %vm28_vm0, %v27_v18, 0.0 }
  0x86   :  { %v20_v16 = vpop.permute.xlu1 %19 }
  0x87   :  { %vm24_vm2 = vcmp.eq.s32.totalorder %v17_v15, %v20_v16 }
  0x88   :  { %v26_v22 = vsel %vm24_vm2, %v12_v1, 0.0 }
  0x89   :  { %v29_v24 = vsel %vm28_vm0, %v26_v22, 0.0 }
  0x90   :  { %v40_v7 = vpop.xlane.xlu0 %39 }
  0x91   :  { %v42_v8 = vsub.f32 %v13_v0, %v40_v7 }
  0x93   :  { %v45_v9 = vmul.f32 1.442695, %v42_v8 }
  0x94   :  { %v37_v10 = vpop.xlane.xlu0 %36 }
  0x95   :  { %107 = vpow2.f32 %v45_v9  ;;  %v41_v12 = vsub.f32 %v12_v1, %v37_v10 }
  0x97   :  { %v43_v13 = vmul.f32 1.442695, %v41_v12 }
  0x99   :  { %109 = vpow2.f32 %v43_v13 }
  0x9f   :  { %v108_v17 = vpop.eup %107 }
  0xa0   :  { %v50_v19 = vsel %vm28_vm0, %v108_v17, 0.0 }
  0xa1   :  { %51 = vadd.xlane.f32.xlu0 %v50_v19 }
  0xa3   :  { %v110_v21 = vpop.eup %109 }
  0xa4   :  { %v47_v23 = vsel %vm28_vm0, %v110_v21, 0.0 }
  0xa5   :  { %48 = vadd.xlane.f32.xlu1 %v47_v23  ;;  %33 = vadd.xlane.f32.xlu0 %v32_v20 }
  0xa9   :  { %30 = vadd.xlane.f32.xlu0 %v29_v24 }
 0x12e   :  { %v52_v25 = vpop.xlane.xlu0 %51 }
 0x12f   :  { %111 = vlog2.f32 %v52_v25 }
 0x132   :  { %v49_v26 = vpop.xlane.xlu1 %48  ;;  %v34_v31 = vpop.xlane.xlu0 %33 }
 0x133   :  { %113 = vlog2.f32 %v49_v26 }
 0x136   :  { %v31_v38 = vpop.xlane.xlu0 %30 }
 0x139   :  { %v112_v28 = vpop.eup %111 }
 0x13a   :  { %v56_v29 = vmul.f32 0.6931472, %v112_v28 }
 0x13c   :  { %v58_v32 = vadd.f32 %v56_v29, %v40_v7 }
 0x13d   :  { %v114_v33 = vpop.eup %113 }
 0x13e   :  { %v54_v34 = vmul.f32 0.6931472, %v114_v33  ;;  %v60_v35 = vsub.f32 %v58_v32, %v34_v31 }
 0x140   :  { %v57_v36 = vadd.f32 %v54_v34, %v37_v10  ;;  %v71_v37 = vsel %vm69_vm3, %v60_v35, 0.0 }
 0x141   :  { %v74_v41 = vsel %vm72_vm4, %v71_v37, 0.0 }
 0x142   :  { %v59_v39 = vsub.f32 %v57_v36, %v31_v38 }
 0x144   :  { %v73_v40 = vsel %vm72_vm4, %v59_v39, 0.0 }
 0x145   :  { %v75_v42 = vadd.f32 %v74_v41, %v73_v40 }
 0x147   :  { %76 = vadd.xlane.f32.xlu0 %v75_v42 }
 0x1d4   :  { %v77_v43 = vpop.xlane.xlu0 %76 }
 0x1d5   :  { %v78_v44 = vrot.slane %v77_v43, 4 }
 0x1d7   :  { %v79_v45 = vadd.f32 %v78_v44, %v77_v43 }
 0x1d9   :  { %v80_v46 = vrot.slane %v79_v45, 2 }
 0x1db   :  { %v81_v47 = vadd.f32 %v80_v46, %v79_v45 }
 0x1dd   :  { %v82_v48 = vrot.slane %v81_v47, 1 }
 0x1df   :  { %v83_v49 = vadd.f32 %v82_v48, %v81_v47 }
 0x1e1   :  { %101 = vpush %v83_v49 }
 0x212   :  { %s102_s17 = spop %101 }
 0x213   :  { %v85_v50 = vstv %s102_s17 }
 0x214   :  { %86 = vst [vmem:[#allocation2] sm:$0xff] %v85_v50 }
 0x215   :  { %126 = shalt.err (!%p123_p4)
}
 0x216   :  { %s127_s21 = scalar_lea.hbm %s188_s2, 128 }
 0x217   :  { %p128_p5 = scmp.ne.s32.totalorder %s188_s2, %s127_s21  ;;  %p131_p6 = scmp.lt.u32.totalorder %s127_s21, %s188_s2 }
 0x219   :  { %p133_p7 = pnand %p131_p6, %p128_p5 }
 0x21b   :  { %136 = shalt.err (!%p133_p7)
}
 0x21c   :  { %96 = dma.vmem_to_hbm [thread:$0]  %s94_s1, 128, %s188_s2, [#allocation3]  }
 0x21d   :  { %137 = dma.done.wait [#allocation3], 128  }
 0x21e   :  { %138 = vsyncadd [#allocation3], 4294967168 }
 0x21f   :  { %100 = vsyncpa [#allocation3], 1 }

</bundles_post_ra>
